<compile_context>
chip_gen: v5e
topology: v5e:2x2
jax: 0.10.0
libtpu: 0.0.40
codegen_flags: <defaults>
</compile_context>

<pallas_src>
import functools

import jax
import jax.numpy as jnp
from jax.experimental import pallas as pl
from jax.experimental.pallas import tpu as pltpu


def _loss_kernel(xa_ref, xst_ref, xat_ref, smw_ref, am_ref, od_ref, out_ref,
                 *, target_bond_len, n_dim):
    """One grid step == TB batch elements.

    Block shapes:
      xa_ref  (TB, M, D)    X_ads
      xst_ref (TB, D, N)    X_slab pre-transposed (slab atoms on lanes)
      xat_ref (TB, D, M)    X_ads  pre-transposed
      smw_ref (TB, N, 2)    columns [slab_mask, 1 - slab_mask] as f32
      am_ref  (M, 1)        ads_mask[:, 0] as f32
      od_ref  (M, M)        mol_origin_dist_mat
      out_ref (TB, 1, 128)  lanes 0/1/2 = [bond, non_bond, keep_origin]
    """
    xa = xa_ref[...]
    xst = xst_ref[...]
    xat = xat_ref[...]
    smw = smw_ref[...]
    am = am_ref[...]
    od = od_ref[...]

    tb, m, _ = xa.shape
    n = xst.shape[2]

    # Pairwise squared distances, accumulated coordinate-by-coordinate (n_dim
    # is tiny & static -> fully unrolled; every slice comes straight from the
    # pre-transposed inputs, so there are no in-kernel transposes).
    d2_sa = jnp.zeros((tb, m, n), jnp.float32)   # ads x slab, slab on lanes
    d2_aa = jnp.zeros((tb, m, m), jnp.float32)   # ads x ads
    for d in range(n_dim):
        a_col = xa[:, :, d:d + 1]     # (TB, M, 1)
        s_row = xst[:, d:d + 1, :]    # (TB, 1, N)
        a_row = xat[:, d:d + 1, :]    # (TB, 1, M)
        diff_sa = a_col - s_row
        d2_sa = d2_sa + diff_sa * diff_sa
        diff_aa = a_col - a_row
        d2_aa = d2_aa + diff_aa * diff_aa

    # rsqrt-based distances (one EUP push per matrix): dist = d2 * rsqrt(d2)
    # is the exact sqrt for d2 > 0 and exactly 0 at d2 == 0 (eps only guards
    # the rsqrt input); the reference's 6/dist is exactly 6*rsqrt(d2).
    eps = 1e-12
    inv_sa = jax.lax.rsqrt(jnp.maximum(d2_sa, eps))
    inv_aa = jax.lax.rsqrt(jnp.maximum(d2_aa, eps))
    dist_sa = d2_sa * inv_sa          # (TB, M, N)
    dist_aa = d2_aa * inv_aa          # (TB, M, M)

    # Pairwise loss matrices.  Masks are NOT applied elementwise: they are
    # separable outer products and fold into the MXU contraction below.
    # (inf*0 -> NaN hazard for coincident fully-masked pairs matches the
    # PyTorch reference.)
    bsq = (dist_sa - target_bond_len) ** 2
    nbm = jnp.where(d2_sa < 9.0, jnp.exp(6.0 * inv_sa) - 1.0, 0.0)

    # Separable-mask reductions on the MXU: contract the (large) N axis with
    # the two slab-weight columns [sm, 1-sm]; finish with the tiny M sum.
    bw = jnp.einsum('bmn,bnk->bmk', bsq, smw,
                    preferred_element_type=jnp.float32)      # (TB, M, 2)
    nw = jnp.einsum('bmn,bnk->bmk', nbm, smw,
                    preferred_element_type=jnp.float32)      # (TB, M, 2)
    b_col = jnp.sum(bw[:, :, 0:1] * am[None, :, :],
                    axis=1, keepdims=True)                   # (TB, 1, 1)
    nb_col = jnp.sum(nw[:, :, 1:2] * (1.0 - am)[None, :, :],
                     axis=1, keepdims=True)                  # (TB, 1, 1)

    # Keep-origin contribution of this batch block (batch-summed in wrapper).
    ksq = (dist_aa - od[None, :, :]) ** 2
    k_col = jnp.sum(jnp.sum(ksq, axis=2, keepdims=True),
                    axis=1, keepdims=True)                   # (TB, 1, 1)

    # Single unmasked lane-dense store: the three sums land in lanes 0..2.
    lane = jax.lax.broadcasted_iota(jnp.int32, out_ref.shape, 2)
    row = jnp.where(lane == 0, b_col, 0.0)
    row = jnp.where(lane == 1, nb_col, row)
    row = jnp.where(lane == 2, k_col, row)
    out_ref[...] = row


def _tpu_layout_params():
    """(tensorcores_per_chip, VMEM budget for block sizing, vmem_limit_bytes).

    Single-TC chips (v5e/v6e): one big grid step is best (per-step overhead is
    pure cost) and 128 MiB physical VMEM allows a generous limit.  v7x and
    unknown chips: assume 2 TensorCores and keep a conservative budget under
    the 32 MiB scoped limit (64 MiB physical on v7x).
    """
    kind = ""
    try:
        kind = jax.devices()[0].device_kind.lower()
    except Exception:
        pass
    single_tc = ("v5 lite" in kind or "v5lite" in kind or "v5e" in kind
                 or "v6" in kind)
    if single_tc:
        return 1, 48 * 1024 * 1024, 64 * 1024 * 1024
    return 2, 20 * 1024 * 1024, 32 * 1024 * 1024


def _ceil_to(x, m):
    return -(-x // m) * m


def _choose_batch_block(B, M, N, D, num_tc, vmem_budget_bytes):
    """Largest TB that (a) divides B, (b) keeps the (parallel) grid length a
    multiple of the chip's TensorCore count when possible, and (c) fits a
    tile-padded ((8,128)-rounded f32) VMEM estimate covering double-buffered
    input blocks plus the live pairwise intermediates."""
    def tile(sub, lane):
        return _ceil_to(max(sub, 1), 8) * _ceil_to(max(lane, 1), 128) * 4

    per_b = (2 * (tile(M, D) + tile(D, N) + tile(D, M)      # X_ads, X_slab^T, X_ads^T
                  + tile(N, 2) + tile(1, 128))               # slab weights, output row
             + 5 * tile(M, N)                                # d2/dist/inv/bsq/nbm (M,N)
             + 3 * tile(M, M)                                # d2/dist/ksq (M,M)
             + 2 * tile(M, 2))                               # einsum results
    const = 2 * (tile(M, 1) + tile(M, M))                    # am + od (grid-invariant)
    budget = max(int(vmem_budget_bytes) - const, per_b)
    tb_cap = max(1, budget // per_b)

    if num_tc > 1 and B >= num_tc:
        tb = min(B // num_tc, tb_cap)
    else:
        tb = min(B, tb_cap)
    tb = max(int(tb), 1)
    while B % tb:
        tb -= 1
    if num_tc > 1:
        # Keep the grid length a multiple of the TC count so no core idles;
        # give up at tb == 1 (ragged batch).
        while tb > 1 and (B // tb) % num_tc:
            tb -= 1
            while B % tb:
                tb -= 1
    return tb


def loss_forward(X_ads, X_slab, slab_mask, ads_mask, mol_origin_dist_mat,
                 target_bond_len, c_b, c_nb, c_k, *, batch_block=None):
    """JAX/Pallas equivalent of _Loss.forward.  Returns loss of shape (n_batch,)."""
    X_ads = X_ads.astype(jnp.float32)
    X_slab = X_slab.astype(jnp.float32)
    B, M, D = X_ads.shape
    _, N, _ = X_slab.shape

    # Wrapper-side layout glue (fuses into the XLA producers for free): only
    # the [..., 0] mask component is used by the reference; the coordinate
    # arrays are pre-transposed so the kernel never transposes; the slab mask
    # is packed as the 2-column weight matrix [sm, 1-sm] for the MXU.
    X_slab_T = jnp.swapaxes(X_slab, 1, 2)                    # (B, D, N)
    X_ads_T = jnp.swapaxes(X_ads, 1, 2)                      # (B, D, M)
    sm = slab_mask[:, :, 0].astype(jnp.float32)              # (B, N)
    smw = jnp.stack([sm, 1.0 - sm], axis=-1)                 # (B, N, 2)
    am = ads_mask[:, 0:1].astype(jnp.float32)                # (M, 1)
    od = mol_origin_dist_mat.astype(jnp.float32)             # (M, M)

    num_tc, vmem_budget, vmem_limit = _tpu_layout_params()
    tb = (batch_block if batch_block is not None
          else _choose_batch_block(B, M, N, D, num_tc, vmem_budget))
    assert B % tb == 0, (B, tb)
    grid = (B // tb,)

    kernel = functools.partial(
        _loss_kernel, target_bond_len=float(target_bond_len), n_dim=D)

    out = pl.pallas_call(
        kernel,
        out_shape=jax.ShapeDtypeStruct((B, 1, 128), jnp.float32),
        grid=grid,
        in_specs=[
            pl.BlockSpec((tb, M, D), lambda b: (b, 0, 0)),   # X_ads
            pl.BlockSpec((tb, D, N), lambda b: (b, 0, 0)),   # X_slab^T
            pl.BlockSpec((tb, D, M), lambda b: (b, 0, 0)),   # X_ads^T
            pl.BlockSpec((tb, N, 2), lambda b: (b, 0, 0)),   # [sm, 1-sm] weights
            pl.BlockSpec((M, 1), lambda b: (0, 0)),          # ads mask column
            pl.BlockSpec((M, M), lambda b: (0, 0)),          # origin dist mat
        ],
        out_specs=pl.BlockSpec((tb, 1, 128), lambda b: (b, 0, 0)),
        compiler_params=pltpu.CompilerParams(
            dimension_semantics=("parallel",),
            vmem_limit_bytes=vmem_limit),
    )(X_ads, X_slab_T, X_ads_T, smw, am, od)

    # Cheap glue: keep-origin loss is summed over the whole batch in the
    # reference and broadcast-added to every batch element.
    return (c_b * out[:, 0, 0] + c_nb * out[:, 0, 1]
            + c_k * jnp.sum(out[:, 0, 2]))


def _reference_loss(X_ads, X_slab, slab_mask, ads_mask, od,
                    target_bond_len, c_b, c_nb, c_k):
    """Pure-JAX transcription of the PyTorch module, for verification."""
    X_ads = X_ads.astype(jnp.float32)
    X_slab = X_slab.astype(jnp.float32)
    dist_nb = jnp.linalg.norm(
        X_slab[:, :, None, :] - X_ads[:, None, :, :], axis=-1)
    tol_b = (slab_mask[:, :, None, :] * ads_mask[None, None, :, :])[..., 0]
    b = jnp.sum((dist_nb - target_bond_len) ** 2 * tol_b, axis=(-1, -2))
    nb = jnp.where(dist_nb < 3.0, jnp.exp(6.0 / dist_nb) - 1.0, 0.0)
    tol_nb = ((~slab_mask[:, :, None, :])
              * (~ads_mask[None, None, :, :]))[..., 0]
    nb = jnp.sum(nb * tol_nb, axis=(-1, -2))
    dmat = jnp.linalg.norm(X_ads[:, None, :, :] - X_ads[:, :, None, :], axis=-1)
    k = jnp.sum((dmat - od.astype(jnp.float32)) ** 2)
    return c_b * b + c_nb * nb + c_k * k


if __name__ == "__main__":
    key = jax.random.PRNGKey(0)
    k1, k2, k3, k4, k5, k6, k7 = jax.random.split(key, 7)

    B, M, N, D = 4, 8, 16, 3   # n_batch, n_mol_atom, n_atom, n_dim

    # Adsorbate sits above the slab (z-separated) so slab<->ads distances stay
    # >= ~1.5, keeping exp(6/d) well conditioned.
    X_ads = jnp.concatenate(
        [jax.random.uniform(k1, (B, M, 2), jnp.float32, 0.0, 6.0),
         jax.random.uniform(k2, (B, M, 1), jnp.float32, 3.0, 5.0)], axis=-1)
    X_slab = jnp.concatenate(
        [jax.random.uniform(k3, (B, N, 2), jnp.float32, 0.0, 6.0),
         jax.random.uniform(k4, (B, N, 1), jnp.float32, 0.0, 1.5)], axis=-1)

    # Per-atom boolean masks (broadcast across the coordinate dim).
    slab_mask = jnp.broadcast_to(
        jax.random.bernoulli(k5, 0.5, (B, N, 1)), (B, N, D))
    ads_mask = jnp.broadcast_to(
        jax.random.bernoulli(k6, 0.5, (M, 1)), (M, D))

    # Reference geometry -> pairwise distance matrix of the original molecule.
    X0 = jax.random.uniform(k7, (M, D), jnp.float32, 0.0, 4.0)
    mol_origin_dist_mat = jnp.linalg.norm(
        X0[:, None, :] - X0[None, :, :], axis=-1)

    target_bond_len = 1.5
    c_b, c_nb, c_k = 1.0, 0.5, 0.1

    loss = loss_forward(X_ads, X_slab, slab_mask, ads_mask,
                        mol_origin_dist_mat, target_bond_len, c_b, c_nb, c_k)
    loss = jax.block_until_ready(loss)

    ref = _reference_loss(X_ads, X_slab, slab_mask, ads_mask,
                          mol_origin_dist_mat, target_bond_len, c_b, c_nb, c_k)
    assert loss.shape == (B,)
    # rsqrt-based exact distances (no approx reciprocal) -> tolerance tightened
    # vs the previous 1e-2; residual slack covers EUP exp / MXU-accumulation
    # rounding differences.
    assert jnp.allclose(loss, ref, rtol=2e-3, atol=1e-3), (loss, ref)

    print("KERNEL_OK")
</pallas_src>

<mosaic_0001>
module attributes {stable_mosaic.version = 11 : i64} {
  func.func @_loss_kernel(%arg0: i32, %arg1: memref<2x8x3xf32, #tpu.memory_space<vmem>>, %arg2: memref<2x3x16xf32, #tpu.memory_space<vmem>>, %arg3: memref<2x3x8xf32, #tpu.memory_space<vmem>>, %arg4: memref<2x16x2xf32, #tpu.memory_space<vmem>>, %arg5: memref<8x1xf32, #tpu.memory_space<vmem>>, %arg6: memref<8x8xf32, #tpu.memory_space<vmem>>, %arg7: memref<2x1x128xf32, #tpu.memory_space<vmem>>) attributes {dimension_semantics = [#tpu.dimension_semantics<parallel>], iteration_bounds = array<i64: 2>, scalar_prefetch = 0 : i64, scratch_operands = 0 : i64, tpu.core_type = #tpu.core_type<tc>, window_params = [{transform_indices = @transform_0, window_bounds = array<i64: 2, 8, 3>}, {transform_indices = @transform_1, window_bounds = array<i64: 2, 3, 16>}, {transform_indices = @transform_2, window_bounds = array<i64: 2, 3, 8>}, {transform_indices = @transform_3, window_bounds = array<i64: 2, 16, 2>}, {pipeline_mode = #tpu.pipeline_mode<synchronous>, transform_indices = @transform_4, window_bounds = array<i64: 8, 1>}, {pipeline_mode = #tpu.pipeline_mode<synchronous>, transform_indices = @transform_5, window_bounds = array<i64: 8, 8>}, {transform_indices = @transform_6, window_bounds = array<i64: 2, 1, 128>}]} {
    %c0 = arith.constant 0 : index
    %c0_0 = arith.constant 0 : index
    %c0_1 = arith.constant 0 : index
    %0 = vector.load %arg1[%c0, %c0_0, %c0_1] : memref<2x8x3xf32, #tpu.memory_space<vmem>>, vector<2x8x3xf32>
    %c0_2 = arith.constant 0 : index
    %c0_3 = arith.constant 0 : index
    %c0_4 = arith.constant 0 : index
    %1 = vector.load %arg2[%c0_2, %c0_3, %c0_4] : memref<2x3x16xf32, #tpu.memory_space<vmem>>, vector<2x3x16xf32>
    %c0_5 = arith.constant 0 : index
    %c0_6 = arith.constant 0 : index
    %c0_7 = arith.constant 0 : index
    %2 = vector.load %arg3[%c0_5, %c0_6, %c0_7] : memref<2x3x8xf32, #tpu.memory_space<vmem>>, vector<2x3x8xf32>
    %c0_8 = arith.constant 0 : index
    %c0_9 = arith.constant 0 : index
    %c0_10 = arith.constant 0 : index
    %3 = vector.load %arg4[%c0_8, %c0_9, %c0_10] : memref<2x16x2xf32, #tpu.memory_space<vmem>>, vector<2x16x2xf32>
    %c0_11 = arith.constant 0 : index
    %c0_12 = arith.constant 0 : index
    %4 = vector.load %arg5[%c0_11, %c0_12] : memref<8x1xf32, #tpu.memory_space<vmem>>, vector<8x1xf32>
    %c0_13 = arith.constant 0 : index
    %c0_14 = arith.constant 0 : index
    %5 = vector.load %arg6[%c0_13, %c0_14] : memref<8x8xf32, #tpu.memory_space<vmem>>, vector<8x8xf32>
    %cst = arith.constant 0.000000e+00 : f32
    %6 = vector.broadcast %cst : f32 to vector<2x8x16xf32>
    %cst_15 = arith.constant 0.000000e+00 : f32
    %7 = vector.broadcast %cst_15 : f32 to vector<2x8x8xf32>
    %8 = vector.extract_strided_slice %0 {offsets = [0, 0, 0], sizes = [2, 8, 1], strides = [1, 1, 1]} : vector<2x8x3xf32> to vector<2x8x1xf32>
    %9 = vector.extract_strided_slice %1 {offsets = [0, 0, 0], sizes = [2, 1, 16], strides = [1, 1, 1]} : vector<2x3x16xf32> to vector<2x1x16xf32>
    %10 = vector.extract_strided_slice %2 {offsets = [0, 0, 0], sizes = [2, 1, 8], strides = [1, 1, 1]} : vector<2x3x8xf32> to vector<2x1x8xf32>
    %11 = vector.broadcast %8 : vector<2x8x1xf32> to vector<2x8x16xf32>
    %12 = vector.broadcast %9 : vector<2x1x16xf32> to vector<2x8x16xf32>
    %13 = arith.subf %11, %12 : vector<2x8x16xf32>
    %14 = arith.mulf %13, %13 : vector<2x8x16xf32>
    %15 = arith.addf %6, %14 : vector<2x8x16xf32>
    %16 = vector.broadcast %8 : vector<2x8x1xf32> to vector<2x8x8xf32>
    %17 = vector.broadcast %10 : vector<2x1x8xf32> to vector<2x8x8xf32>
    %18 = arith.subf %16, %17 : vector<2x8x8xf32>
    %19 = arith.mulf %18, %18 : vector<2x8x8xf32>
    %20 = arith.addf %7, %19 : vector<2x8x8xf32>
    %21 = vector.extract_strided_slice %0 {offsets = [0, 0, 1], sizes = [2, 8, 1], strides = [1, 1, 1]} : vector<2x8x3xf32> to vector<2x8x1xf32>
    %22 = vector.extract_strided_slice %1 {offsets = [0, 1, 0], sizes = [2, 1, 16], strides = [1, 1, 1]} : vector<2x3x16xf32> to vector<2x1x16xf32>
    %23 = vector.extract_strided_slice %2 {offsets = [0, 1, 0], sizes = [2, 1, 8], strides = [1, 1, 1]} : vector<2x3x8xf32> to vector<2x1x8xf32>
    %24 = vector.broadcast %21 : vector<2x8x1xf32> to vector<2x8x16xf32>
    %25 = vector.broadcast %22 : vector<2x1x16xf32> to vector<2x8x16xf32>
    %26 = arith.subf %24, %25 : vector<2x8x16xf32>
    %27 = arith.mulf %26, %26 : vector<2x8x16xf32>
    %28 = arith.addf %15, %27 : vector<2x8x16xf32>
    %29 = vector.broadcast %21 : vector<2x8x1xf32> to vector<2x8x8xf32>
    %30 = vector.broadcast %23 : vector<2x1x8xf32> to vector<2x8x8xf32>
    %31 = arith.subf %29, %30 : vector<2x8x8xf32>
    %32 = arith.mulf %31, %31 : vector<2x8x8xf32>
    %33 = arith.addf %20, %32 : vector<2x8x8xf32>
    %34 = vector.extract_strided_slice %0 {offsets = [0, 0, 2], sizes = [2, 8, 1], strides = [1, 1, 1]} : vector<2x8x3xf32> to vector<2x8x1xf32>
    %35 = vector.extract_strided_slice %1 {offsets = [0, 2, 0], sizes = [2, 1, 16], strides = [1, 1, 1]} : vector<2x3x16xf32> to vector<2x1x16xf32>
    %36 = vector.extract_strided_slice %2 {offsets = [0, 2, 0], sizes = [2, 1, 8], strides = [1, 1, 1]} : vector<2x3x8xf32> to vector<2x1x8xf32>
    %37 = vector.broadcast %34 : vector<2x8x1xf32> to vector<2x8x16xf32>
    %38 = vector.broadcast %35 : vector<2x1x16xf32> to vector<2x8x16xf32>
    %39 = arith.subf %37, %38 : vector<2x8x16xf32>
    %40 = arith.mulf %39, %39 : vector<2x8x16xf32>
    %41 = arith.addf %28, %40 : vector<2x8x16xf32>
    %42 = vector.broadcast %34 : vector<2x8x1xf32> to vector<2x8x8xf32>
    %43 = vector.broadcast %36 : vector<2x1x8xf32> to vector<2x8x8xf32>
    %44 = arith.subf %42, %43 : vector<2x8x8xf32>
    %45 = arith.mulf %44, %44 : vector<2x8x8xf32>
    %46 = arith.addf %33, %45 : vector<2x8x8xf32>
    %cst_16 = arith.constant 9.99999996E-13 : f32
    %47 = vector.broadcast %cst_16 : f32 to vector<2x8x16xf32>
    %48 = arith.maximumf %41, %47 : vector<2x8x16xf32>
    %49 = math.rsqrt %48 : vector<2x8x16xf32>
    %cst_17 = arith.constant 9.99999996E-13 : f32
    %50 = vector.broadcast %cst_17 : f32 to vector<2x8x8xf32>
    %51 = arith.maximumf %46, %50 : vector<2x8x8xf32>
    %52 = math.rsqrt %51 : vector<2x8x8xf32>
    %53 = arith.mulf %41, %49 : vector<2x8x16xf32>
    %54 = arith.mulf %46, %52 : vector<2x8x8xf32>
    %cst_18 = arith.constant 1.500000e+00 : f32
    %55 = vector.broadcast %cst_18 : f32 to vector<2x8x16xf32>
    %56 = arith.subf %53, %55 : vector<2x8x16xf32>
    %57 = arith.mulf %56, %56 : vector<2x8x16xf32>
    %cst_19 = arith.constant 9.000000e+00 : f32
    %58 = vector.broadcast %cst_19 : f32 to vector<2x8x16xf32>
    %59 = arith.cmpf olt, %41, %58 : vector<2x8x16xf32>
    %cst_20 = arith.constant 6.000000e+00 : f32
    %60 = vector.broadcast %cst_20 : f32 to vector<2x8x16xf32>
    %61 = arith.mulf %60, %49 : vector<2x8x16xf32>
    %62 = math.exp %61 : vector<2x8x16xf32>
    %cst_21 = arith.constant 1.000000e+00 : f32
    %63 = vector.broadcast %cst_21 : f32 to vector<2x8x16xf32>
    %64 = arith.subf %62, %63 : vector<2x8x16xf32>
    %cst_22 = arith.constant 0.000000e+00 : f32
    %65 = vector.broadcast %cst_22 : f32 to vector<2x8x16xf32>
    %66 = arith.select %59, %64, %65 : vector<2x8x16xi1>, vector<2x8x16xf32>
    "tpu.trace_start"() <{level = 10 : i32, message = "bmn,bnk->bmk"}> : () -> ()
    %cst_23 = arith.constant dense<0.000000e+00> : vector<2x8x2xf32>
    %67 = tpu.matmul %57, %3, %cst_23 {dimension_numbers = #tpu.dot_dimension_numbers<[2], [1], [1], [2], [0, 0, 0, 1, 1, 2], [0], [0]>} : vector<2x8x16xf32>, vector<2x16x2xf32>, vector<2x8x2xf32> -> vector<2x8x2xf32>
    %cst_24 = arith.constant dense<0.000000e+00> : vector<2x8x2xf32>
    %68 = tpu.matmul %66, %3, %cst_24 {dimension_numbers = #tpu.dot_dimension_numbers<[2], [1], [1], [2], [0, 0, 0, 1, 1, 2], [0], [0]>} : vector<2x8x16xf32>, vector<2x16x2xf32>, vector<2x8x2xf32> -> vector<2x8x2xf32>
    "tpu.trace_stop"() : () -> ()
    %69 = vector.extract_strided_slice %67 {offsets = [0, 0, 0], sizes = [2, 8, 1], strides = [1, 1, 1]} : vector<2x8x2xf32> to vector<2x8x1xf32>
    %70 = vector.shape_cast %4 : vector<8x1xf32> to vector<1x8x1xf32>
    %71 = vector.broadcast %70 : vector<1x8x1xf32> to vector<2x8x1xf32>
    %72 = arith.mulf %69, %71 : vector<2x8x1xf32>
    %cst_25 = arith.constant dense<0.000000e+00> : vector<2x1xf32>
    %73 = vector.multi_reduction <add>, %72, %cst_25 [1] : vector<2x8x1xf32> to vector<2x1xf32>
    %74 = vector.shape_cast %73 : vector<2x1xf32> to vector<2x1x1xf32>
    %75 = vector.extract_strided_slice %68 {offsets = [0, 0, 1], sizes = [2, 8, 1], strides = [1, 1, 1]} : vector<2x8x2xf32> to vector<2x8x1xf32>
    %cst_26 = arith.constant 1.000000e+00 : f32
    %76 = vector.broadcast %cst_26 : f32 to vector<8x1xf32>
    %77 = arith.subf %76, %4 : vector<8x1xf32>
    %78 = vector.shape_cast %77 : vector<8x1xf32> to vector<1x8x1xf32>
    %79 = vector.broadcast %78 : vector<1x8x1xf32> to vector<2x8x1xf32>
    %80 = arith.mulf %75, %79 : vector<2x8x1xf32>
    %cst_27 = arith.constant dense<0.000000e+00> : vector<2x1xf32>
    %81 = vector.multi_reduction <add>, %80, %cst_27 [1] : vector<2x8x1xf32> to vector<2x1xf32>
    %82 = vector.shape_cast %81 : vector<2x1xf32> to vector<2x1x1xf32>
    %83 = vector.shape_cast %5 : vector<8x8xf32> to vector<1x8x8xf32>
    %84 = vector.broadcast %83 : vector<1x8x8xf32> to vector<2x8x8xf32>
    %85 = arith.subf %54, %84 : vector<2x8x8xf32>
    %86 = arith.mulf %85, %85 : vector<2x8x8xf32>
    %cst_28 = arith.constant dense<0.000000e+00> : vector<2x8xf32>
    %87 = vector.multi_reduction <add>, %86, %cst_28 [2] : vector<2x8x8xf32> to vector<2x8xf32>
    %88 = vector.shape_cast %87 : vector<2x8xf32> to vector<2x8x1xf32>
    %cst_29 = arith.constant dense<0.000000e+00> : vector<2x1xf32>
    %89 = vector.multi_reduction <add>, %88, %cst_29 [1] : vector<2x8x1xf32> to vector<2x1xf32>
    %90 = vector.shape_cast %89 : vector<2x1xf32> to vector<2x1x1xf32>
    %91 = tpu.iota {dimensions = array<i32: 2>} : vector<2x1x128xi32>
    %c0_i32 = arith.constant 0 : i32
    %92 = vector.broadcast %c0_i32 : i32 to vector<2x1x128xi32>
    %93 = arith.cmpi eq, %91, %92 : vector<2x1x128xi32>
    %cst_30 = arith.constant 0.000000e+00 : f32
    %94 = vector.shape_cast %74 : vector<2x1x1xf32> to vector<2x1x1xf32>
    %95 = vector.broadcast %94 : vector<2x1x1xf32> to vector<2x1x128xf32>
    %96 = vector.broadcast %cst_30 : f32 to vector<2x1x128xf32>
    %97 = arith.select %93, %95, %96 : vector<2x1x128xi1>, vector<2x1x128xf32>
    %c1_i32 = arith.constant 1 : i32
    %98 = vector.broadcast %c1_i32 : i32 to vector<2x1x128xi32>
    %99 = arith.cmpi eq, %91, %98 : vector<2x1x128xi32>
    %100 = vector.shape_cast %82 : vector<2x1x1xf32> to vector<2x1x1xf32>
    %101 = vector.broadcast %100 : vector<2x1x1xf32> to vector<2x1x128xf32>
    %102 = arith.select %99, %101, %97 : vector<2x1x128xi1>, vector<2x1x128xf32>
    %c2_i32 = arith.constant 2 : i32
    %103 = vector.broadcast %c2_i32 : i32 to vector<2x1x128xi32>
    %104 = arith.cmpi eq, %91, %103 : vector<2x1x128xi32>
    %105 = vector.shape_cast %90 : vector<2x1x1xf32> to vector<2x1x1xf32>
    %106 = vector.broadcast %105 : vector<2x1x1xf32> to vector<2x1x128xf32>
    %107 = arith.select %104, %106, %102 : vector<2x1x128xi1>, vector<2x1x128xf32>
    %c0_31 = arith.constant 0 : index
    %c0_32 = arith.constant 0 : index
    %c0_33 = arith.constant 0 : index
    %108 = vector.load %arg7[%c0_31, %c0_32, %c0_33] : memref<2x1x128xf32, #tpu.memory_space<vmem>>, vector<2x1x128xf32>
    tpu.vector_store %arg7[%c0_31, %c0_32, %c0_33], %107 {strides = array<i32>} : memref<2x1x128xf32, #tpu.memory_space<vmem>>, vector<2x1x128xf32>,
    return
  }
  func.func @transform_0(%arg0: i32) -> (i32, i32, i32) {
    %c0_i32 = arith.constant 0 : i32
    %c0_i32_0 = arith.constant 0 : i32
    %c0_i32_1 = arith.constant 0 : i32
    return %arg0, %c0_i32, %c0_i32_0 : i32, i32, i32
  }
  func.func @transform_1(%arg0: i32) -> (i32, i32, i32) {
    %c0_i32 = arith.constant 0 : i32
    %c0_i32_0 = arith.constant 0 : i32
    %c0_i32_1 = arith.constant 0 : i32
    return %arg0, %c0_i32, %c0_i32_0 : i32, i32, i32
  }
  func.func @transform_2(%arg0: i32) -> (i32, i32, i32) {
    %c0_i32 = arith.constant 0 : i32
    %c0_i32_0 = arith.constant 0 : i32
    %c0_i32_1 = arith.constant 0 : i32
    return %arg0, %c0_i32, %c0_i32_0 : i32, i32, i32
  }
  func.func @transform_3(%arg0: i32) -> (i32, i32, i32) {
    %c0_i32 = arith.constant 0 : i32
    %c0_i32_0 = arith.constant 0 : i32
    %c0_i32_1 = arith.constant 0 : i32
    return %arg0, %c0_i32, %c0_i32_0 : i32, i32, i32
  }
  func.func @transform_4(%arg0: i32) -> (i32, i32) {
    %c0_i32 = arith.constant 0 : i32
    %c0_i32_0 = arith.constant 0 : i32
    %c0_i32_1 = arith.constant 0 : i32
    return %c0_i32, %c0_i32_0 : i32, i32
  }
  func.func @transform_5(%arg0: i32) -> (i32, i32) {
    %c0_i32 = arith.constant 0 : i32
    %c0_i32_0 = arith.constant 0 : i32
    %c0_i32_1 = arith.constant 0 : i32
    return %c0_i32, %c0_i32_0 : i32, i32
  }
  func.func @transform_6(%arg0: i32) -> (i32, i32, i32) {
    %c0_i32 = arith.constant 0 : i32
    %c0_i32_0 = arith.constant 0 : i32
    %c0_i32_1 = arith.constant 0 : i32
    return %arg0, %c0_i32, %c0_i32_0 : i32, i32, i32
  }
}

</mosaic_0001>

<bundles_post_ra>
// kernel: tpu_custom_call.1
= control target key start
LH: loop header
LB: loop body
LE: loop exit
PB: predicated region body
PF: predicated region fallthrough
CT: control target
= control target key end

     0   :  { %11 = vsyncpa [#allocation3], 0  ;;  %s1114_s0 = inlined_call_operand.vmem [shape: f32[4,8,3], index: 0, kind: input, shape index: {}]   ;;  %s1115_s1 = inlined_call_operand.vmem [shape: f32[4,3,16], index: 1, kind: input, shape index: {}]   ;;  %s1116_s2 = inlined_call_operand.vmem [shape: f32[4,3,8], index: 2, kind: input, shape index: {}]   ;;  %s1117_s3 = inlined_call_operand.vmem [shape: f32[4,16,2], index: 3, kind: input, shape index: {}]   ;;  %s1118_s4 = inlined_call_operand.vmem [shape: f32[8,1], index: 4, kind: input, shape index: {}]   ;;  %s1119_s5 = inlined_call_operand.vmem [shape: f32[8,8], index: 5, kind: input, shape index: {}]   ;;  %s1120_s6 = inlined_call_operand.hbm [shape: f32[4,1,128], index: 6, kind: output, shape index: {}]  }
   0x1   :  { %13 = vsyncpa [#allocation3 + $0x1], 0  ;;  %s964_s21 = smov 0   ;;  %s966_s22 = smov 0  }
   0x2   :  { %s968_s23 = smov 0   ;;  %s970_s24 = smov 0  }
   0x3 LB: > { %s772_s25 = sadd.s32 4294967295, %s922_s24   ;;  %s773_s26 = sadd.s32 4294967294, %s922_s24   ;;  %s922_s24 = sphi %s970_s24, %s1126_s24   ;;  %s918_s23 = sphi %s968_s23, %s1125_s23   ;;  %s914_s22 = sphi %s966_s22, %s1124_s22   ;;  %s910_s21 = sphi %s964_s21, %s1123_s21  }
   0x4   : > { %s987_s27 = sadd.s32 1, %s922_s24   ;;  %s172_s28 = sadd.s32 1, %s918_s23 }
   0x5   : > { %s169_s29 = ssub.s32 %s922_s24, %s987_s27  ;;  %p182_p0 = scmp.ne.s32.totalorder %s918_s23, %s914_s22 }
   0x6   : > { %p170_p1 = scmp.eq.s32.totalorder %s169_s29, 0  ;;  %p183_p2 = scmp.eq.s32.totalorder %s772_s25, 1 }
   0x7   : > { %p188_p3 = scmp.ne.s32.totalorder %s914_s22, %s910_s21  ;;  %p189_p4 = scmp.eq.s32.totalorder %s773_s26, 1 }
   0x8   : > { %s997_s30 = scalar_select %p170_p1, %s918_s23, %s172_s28  }
   0x9   : > { %p999_p5 = por %p183_p2, %p182_p0  ;;  %p1003_p6 = por %p189_p4, %p188_p3 }
   0xa   : > { %p776_p7 = scmp.ge.s32.totalorder %s922_s24, 1  ;;  %p250_p8 = scmp.lt.s32.totalorder %s922_s24, 3 }
   0xc   : > { %p251_p9 = pnand %p776_p7, %p250_p8 }
   0xd   : > { %s1009_s9 = sshll.u32 (!%p251_p9), %s772_s25, 1  ;;  %s927_s13 = smov (!%p251_p9), 1  }
   0xe   : > { %254 = sbr.rel (%p251_p9) target bundleno = 461 (0x1cd), region = 44  ;;  %p297_p10 = scmp.lt.s32.totalorder (!%p251_p9), %s1009_s9, 3 }
   0xf   : > { %s293_s16 = sand.u32 (!%p251_p9), 1, %s914_s22   ;;  %s671_s20 = scalar_lea.hbm (!%p251_p9), %s1120_s6, %s1009_s9 }
  0x10   : > { %s777_s17 = sshll.u32 (!%p251_p9), %s293_s16, 1  ;;  %s674_s28 = sshll.u32 (!%p251_p9), %s671_s20, 4  ;;  %s675_s28 = int_to_ptr.hbm [resolvable:$true] %s674_s28 }
  0x11   : > { %s661_s29 = scalar_lea.sflag (!%p251_p9), [#allocation3], %s293_s16 }
  0x13   : > { %v924_v0 = vmov 1   ;;  %v925_v1 = vmov 0   ;;  %v926_v2 = vmov 2   ;;  %s298_s10 = scalar_select %p297_p10, %s1009_s9, 3  ;;  %vm472_vm6 = vcmask 130048  }
  0x14   : > { %845 = vset.pattern.permute.xlu1 %v924_v0  ;;  %844 = vset.pattern.permute.xlu0 %v925_v1  ;;  %vm608_vm7 = vcmask 64512  }
  0x15   : > { %846 = vset.pattern.permute.xlu2 %v926_v2  ;;  %s779_s11 = sshll.u32 %s298_s10, 3  ;;  %s781_s15 = sshll.u32 %s298_s10, 2 }
  0x16   : > { %s300_s14 = scalar_lea.vmem %s1114_s0, %s779_s11  ;;  %s1020_s18 = scalar_lea.vmem %s1115_s1, %s781_s15 }
  0x17   : > { %v322_v3 = vld [vmem:[%s300_s14] sm:$0xff]  ;;  %v323_v4 = vld [vmem:[%s300_s14 + $0x8] sm:$0xff]  ;;  %s1025_s25 = scalar_lea.vmem %s1116_s2, %s781_s15  ;;  %s799_s26 = sshll.u32 %s298_s10, 4 }
  0x18   : > { %361 = vperm.xlu1 %845, %v322_v3   ;;  %336 = vperm.xlu0 %844, %v322_v3   ;;  %v324_v5 = vld [vmem:[%s1020_s18] sm:$0x7]  ;;  %s1032_s11 = scalar_lea.vmem %s1117_s3, %s799_s26  ;;  %v325_v30 = vld [vmem:[%s1020_s18 + $0x4] sm:$0x7]  ;;  %s880_s14 = scalar_lea.hbm %s1120_s6, 4 }
  0x19   : > { %385 = vperm.xlu2 %846, %v322_v3   ;;  %v326_v6 = vld [vmem:[%s1025_s25] sm:$0x7]  ;;  %v392_v7 = vperm.slane %v324_v5, 2  ;;  %v329_v9 = vld [vmem:[%s1032_s11 + $0x8] sm:$0xff]  ;;  %v368_v12 = vperm.slane %v324_v5, 1  ;;  %v344_v14 = vperm.slane %v324_v5, 0 }
  0x1a   : > { %v400_v8 = vperm.slane %v326_v6, 2  ;;  %v328_v10 = vld [vmem:[%s1032_s11] sm:$0xff]  ;;  %v376_v13 = vperm.slane %v326_v6, 1  ;;  %v352_v15 = vperm.slane %v326_v6, 0  ;;  %490 = vmatpush.msra.mxu0 %v329_v9  ;;  %536 = vmatpush.msra.mxu2 %v329_v9  ;;  %v369_v34 = vperm.slane %v325_v30, 1  ;;  %v331_v36 = vld [vmem:[%s1032_s11 + $0x18] sm:$0xff] }
  0x1b   : > { %v327_v31 = vld [vmem:[%s1025_s25 + $0x4] sm:$0x7]  ;;  %v330_v37 = vld [vmem:[%s1032_s11 + $0x10] sm:$0xff]  ;;  %v393_v38 = vperm.slane %v325_v30, 2  ;;  %v345_v40 = vperm.slane %v325_v30, 0  ;;  %513 = vmatpush.msra.mxu1 %v331_v36  ;;  %559 = vmatpush.msra.mxu3 %v331_v36  ;;  %s295_s25 = scalar_lea.vmem [#allocation2], %s777_s17 }
  0x1c   : > { %491 = vmatpush.msra.mxu0 %v328_v10  ;;  %537 = vmatpush.msra.mxu2 %v328_v10  ;;  %v377_v35 = vperm.slane %v327_v31, 1  ;;  %v401_v39 = vperm.slane %v327_v31, 2  ;;  %v353_v41 = vperm.slane %v327_v31, 0  ;;  %v1052_v9 = vld [vmem:[%s1118_s4] sm:$0xff]  ;;  %s672_s26 = sshll.u32 %s295_s25, 4  ;;  %s874_s11 = sshra.s32 %s675_s28, 4  ;;  %s673_s26 = int_to_ptr.vmem [resolvable:$true] %s672_s26  ;;  %s875_s11 = int_to_ptr.hbm [resolvable:$true] %s874_s11 }
  0x1d   : > { %514 = vmatpush.msra.mxu1 %v330_v37  ;;  %560 = vmatpush.msra.mxu3 %v330_v37  ;;  %s876_s9 = scalar_lea.hbm %s875_s11, 2  ;;  %p881_p0 = scmp.lt.s32.totalorder %s875_s11, %s1120_s6 }
  0x1e   : > { %p877_p11 = scmp.ne.s32.totalorder %s875_s11, %s876_s9  ;;  %p882_p1 = scmp.lt.s32.totalorder %s880_s14, %s876_s9 }
  0x20   : > { %365 = vperm.xlu1 %845, %v323_v4   ;;  %341 = vperm.xlu0 %844, %v323_v4   ;;  %p878_p12 = pnand %p877_p11, %p999_p5  ;;  %p883_p2 = por %p882_p1, %p881_p0 }
  0x21   : > { %389 = vperm.xlu2 %846, %v323_v4  }
  0x22   : > { %p879_p13 = pneg %p878_p12 }
  0x24   : > { %p884_p3 = pnand %p883_p2, %p879_p13 }
  0x73   : > { %v386_v11 = vpop.permute.xlu2 %385 }
  0x74   : > { %v394_v16 = vsub.f32 %v386_v11, %v392_v7  ;;  %v402_v17 = vsub.f32 %v386_v11, %v400_v8  ;;  %v582_v11 = vsub.f32 1.0, %v1052_v9 }
  0x76   : > { %v396_v24 = vmul.f32 %v394_v16, %v394_v16  ;;  %v404_v25 = vmul.f32 %v402_v17, %v402_v17  ;;  %584 = vrot.lane.b32.xlu0 %v582_v11, %s927_s13 }
  0x7b   : > { %v390_v44 = vpop.permute.xlu2 %389 }
  0x7c   : > { %v395_v51 = vsub.f32 %v390_v44, %v393_v38  ;;  %v403_v52 = vsub.f32 %v390_v44, %v401_v39 }
  0x7e   : > { %v397_v59 = vmul.f32 %v395_v51, %v395_v51  ;;  %v405_v60 = vmul.f32 %v403_v52, %v403_v52 }
  0x8a   : > { %v362_v18 = vpop.permute.xlu1 %361  ;;  %v337_v19 = vpop.permute.xlu0 %336 }
  0x8b   : > { %v370_v20 = vsub.f32 %v362_v18, %v368_v12  ;;  %v378_v21 = vsub.f32 %v362_v18, %v376_v13  ;;  %v346_v22 = vsub.f32 %v337_v19, %v344_v14  ;;  %v354_v23 = vsub.f32 %v337_v19, %v352_v15 }
  0x8d   : > { %v372_v26 = vmul.f32 %v370_v20, %v370_v20  ;;  %v380_v27 = vmul.f32 %v378_v21, %v378_v21  ;;  %v348_v28 = vmul.f32 %v346_v22, %v346_v22  ;;  %v356_v29 = vmul.f32 %v354_v23, %v354_v23 }
  0x8f   : > { %v374_v32 = vadd.f32 %v372_v26, %v348_v28  ;;  %v382_v33 = vadd.f32 %v380_v27, %v356_v29 }
  0x91   : > { %v1040_v42 = vadd.f32 %v396_v24, %v374_v32  ;;  %v406_v43 = vadd.f32 %v404_v25, %v382_v33  ;;  %v333_v24 = vld [vmem:[%s1119_s5] sm:$0xff] }
  0x92   : > { %v366_v45 = vpop.permute.xlu1 %365  ;;  %v342_v46 = vpop.permute.xlu0 %341 }
  0x93   : > { %v408_v47 = vmax.f32 %v1040_v42, 1e-12  ;;  %v430_v48 = vmax.f32 %v406_v43, 1e-12  ;;  %v371_v49 = vsub.f32 %v366_v45, %v369_v34  ;;  %v379_v50 = vsub.f32 %v366_v45, %v377_v35 }
  0x94   : > { %v347_v53 = vsub.f32 %v342_v46, %v345_v40  ;;  %v355_v54 = vsub.f32 %v342_v46, %v353_v41  ;;  %vm460_vm14 = vcmp.lt.f32.partialorder %v1040_v42, 9.0 }
  0x95   : > { %848 = vrsqrt.f32 %v408_v47  ;;  %v373_v55 = vmul.f32 %v371_v49, %v371_v49  ;;  %v381_v56 = vmul.f32 %v379_v50, %v379_v50  ;;  %vm416_vm2 = vweird.f32 %v408_v47 }
  0x96   : > { %850 = vrsqrt.f32 %v430_v48  ;;  %v349_v57 = vmul.f32 %v347_v53, %v347_v53  ;;  %v357_v58 = vmul.f32 %v355_v54, %v355_v54  ;;  %vm438_vm4 = vweird.f32 %v430_v48 }
  0x98   : > { %v375_v61 = vadd.f32 %v373_v55, %v349_v57  ;;  %v383_v62 = vadd.f32 %v381_v56, %v357_v58 }
  0x9a   : > { %v1043_v63 = vadd.f32 %v397_v59, %v375_v61  ;;  %v1045_v1 = vadd.f32 %v405_v60, %v383_v62 }
  0x9b   : > { %v849_v2 = vpop.eup %848 }
  0x9c   : > { %v851_v3 = vpop.eup %850  ;;  %v411_v4 = vmul.f32 %v849_v2, %v408_v47  ;;  %v409_v5 = vmax.f32 %v1043_v63, 1e-12  ;;  %v431_v6 = vmax.f32 %v1045_v1, 1e-12  ;;  %vm417_vm0 = vweird.f32 %v849_v2 }
  0x9d   : > { %v433_v7 = vmul.f32 %v851_v3, %v430_v48  ;;  %vm439_vm1 = vweird.f32 %v851_v3  ;;  %vm418_vm3 = vmor %vm416_vm2, %vm417_vm0  ;;  %vm461_vm15 = vcmp.lt.f32.partialorder %v1043_v63, 9.0  ;;  %vm567_vm0 = vcmask 7168  }
  0x9e   : > { %852 = vrsqrt.f32 %v409_v5  ;;  %v412_v8 = vmul.f32 %v849_v2, %v411_v4  ;;  %vm440_vm5 = vmor %vm438_vm4, %vm439_vm1  ;;  %vm426_vm10 = vweird.f32 %v409_v5  ;;  %vm448_vm12 = vweird.f32 %v431_v6 }
  0x9f   : > { %854 = vrsqrt.f32 %v431_v6  ;;  %v434_v10 = vmul.f32 %v851_v3, %v433_v7  ;;  %vm589_vm1 = vcmask 15368  }
  0xa0   : > { %v413_v12 = vmul.f32 0.5, %v412_v8 }
  0xa1   : > { %v435_v13 = vmul.f32 0.5, %v434_v10 }
  0xa2   : > { %v414_v14 = vsub.f32 1.5, %v413_v12 }
  0xa3   : > { %v436_v15 = vsub.f32 1.5, %v435_v13 }
  0xa4   : > { %v853_v16 = vpop.eup %852  ;;  %v415_v17 = vmul.f32 %v849_v2, %v414_v14 }
  0xa5   : > { %v855_v18 = vpop.eup %854  ;;  %v421_v19 = vmul.f32 %v853_v16, %v409_v5  ;;  %v437_v20 = vmul.f32 %v851_v3, %v436_v15  ;;  %vm427_vm8 = vweird.f32 %v853_v16 }
  0xa6   : > { %v443_v21 = vmul.f32 %v855_v18, %v431_v6  ;;  %v419_v22 = vsel %vm418_vm3, %v849_v2, %v415_v17  ;;  %vm449_vm9 = vweird.f32 %v855_v18  ;;  %vm428_vm11 = vmor %vm426_vm10, %vm427_vm8 }
  0xa7   : > { %v452_v23 = vmul.f32 %v419_v22, %v1040_v42  ;;  %v441_v25 = vsel %vm440_vm5, %v851_v3, %v437_v20  ;;  %v422_v26 = vmul.f32 %v853_v16, %v421_v19  ;;  %v462_v27 = vmul.f32 6.0, %v419_v22  ;;  %vm450_vm13 = vmor %vm448_vm12, %vm449_vm9 }
  0xa8   : > { %v454_v28 = vmul.f32 %v441_v25, %v406_v43  ;;  %v444_v29 = vmul.f32 %v855_v18, %v443_v21 }
  0xa9   : > { %v787_v30 = vadd.f32 -1.5, %v452_v23  ;;  %v423_v31 = vmul.f32 0.5, %v422_v26  ;;  %v464_v32 = vmul.f32 1.442695, %v462_v27 }
  0xaa   : > { %v604_v33 = vsub.f32 %v454_v28, %v333_v24  ;;  %v445_v34 = vmul.f32 0.5, %v444_v29 }
  0xab   : > { %v458_v35 = vmul.f32 %v787_v30, %v787_v30  ;;  %v424_v36 = vsub.f32 1.5, %v423_v31  ;;  %856 = vpow2.f32 %v464_v32 }
  0xac   : > { %v606_v37 = vmul.f32 %v604_v33, %v604_v33  ;;  %v446_v38 = vsub.f32 1.5, %v445_v34 }
  0xad   : > { %791 = vmatmul.msk.f32.vlgmr.msra.gmra.mxu0 %vm472_vm6, %v458_v35  ;;  %v425_v39 = vmul.f32 %v853_v16, %v424_v36 }
  0xae   : > { %v609_v40 = vsel %vm608_vm7, %v606_v37, 0.0  ;;  %v447_v41 = vmul.f32 %v855_v18, %v446_v38 }
  0xaf   : > { %610 = vadd.xlane.f32.xlu1 %v609_v40  ;;  %v429_v43 = vsel %vm428_vm11, %v853_v16, %v425_v39  ;;  %v627_v40 = vlaneseq }
  0xb0   : > { %v453_v44 = vmul.f32 %v429_v43, %v1043_v63  ;;  %v451_v45 = vsel %vm450_vm13, %v855_v18, %v447_v41  ;;  %v463_v46 = vmul.f32 6.0, %v429_v43 }
  0xb1   : > { %v857_v47 = vpop.eup %856  ;;  %v455_v48 = vmul.f32 %v451_v45, %v1045_v1  ;;  %v628_v45 = vand.u32 127, %v627_v40 }
  0xb2   : > { %v788_v49 = vadd.f32 -1.5, %v453_v44  ;;  %v789_v50 = vadd.f32 -1.0, %v857_v47  ;;  %v466_v51 = vmul.f32 1.442695, %v463_v46 }
  0xb3   : > { %v605_v52 = vsub.f32 %v455_v48, %v333_v24  ;;  %vm629_vm2 = vcmp.eq.s32.totalorder %v628_v45, 0  ;;  %vm642_vm3 = vcmp.eq.s32.totalorder %v628_v45, 1  ;;  %vm655_vm4 = vcmp.eq.s32.totalorder %v628_v45, 2 }
  0xb4   : > { %v459_v53 = vmul.f32 %v788_v49, %v788_v49  ;;  %v470_v54 = vsel %vm460_vm14, %v789_v50, 0.0  ;;  %858 = vpow2.f32 %v466_v51 }
  0xb5   : > { %793 = vmatmul.msk.f32.vlgmr.msra.gmra.mxu2 %vm472_vm6, %v470_v54  ;;  %v607_v55 = vmul.f32 %v605_v52, %v605_v52 }
  0xb6   : > { %792 = vmatmul.msk.f32.vlgmr.msra.gmra.mxu1 %vm472_vm6, %v459_v53 }
  0xb7   : > { %v612_v56 = vsel %vm608_vm7, %v607_v55, 0.0 }
  0xb8   : > { %613 = vadd.xlane.f32.xlu2 %v612_v56 }
  0xba   : > { %v859_v57 = vpop.eup %858 }
  0xbb   : > { %v790_v58 = vadd.f32 -1.0, %v859_v57 }
  0xbd   : > { %v471_v59 = vsel %vm461_vm15, %v790_v58, 0.0 }
  0xbe   : > { %794 = vmatmul.msk.f32.vlgmr.msra.gmra.mxu3 %vm472_vm6, %v471_v59 }
  0xe8   : > { %v585_v7 = vpop.permute.xlu0 %584 }
 0x122   : > { %v611_v33 = vpop.xlane.xlu1 %610 }
 0x123   : > { %v615_v34 = vrot.slane %v611_v33, 4 }
 0x125   : > { %v616_v36 = vadd.f32 %v615_v34, %v611_v33 }
 0x127   : > { %v617_v38 = vrot.slane %v616_v36, 2 }
 0x129   : > { %v618_v43 = vadd.f32 %v617_v38, %v616_v36 }
 0x12a   : > { %v493_v42 = vpop.f32.mrf.mxu0 }
 0x12b   : > { %v565_v60 = vmul.f32 %v493_v42, %v1052_v9  ;;  %v614_v37 = vpop.xlane.xlu2 %613 }
 0x12c   : > { %v621_v39 = vrot.slane %v614_v37, 4 }
 0x12d   : > { %v568_v61 = vsel %vm567_vm0, %v565_v60, 0.0 }
 0x12e   : > { %v569_v62 = vrot.slane %v568_v61, 4  ;;  %v622_v44 = vadd.f32 %v621_v39, %v614_v37 }
 0x130   : > { %v570_v1 = vadd.f32 %v569_v62, %v568_v61  ;;  %v623_v46 = vrot.slane %v622_v44, 2 }
 0x132   : > { %v571_v2 = vrot.slane %v570_v1, 2  ;;  %v624_v48 = vadd.f32 %v623_v46, %v622_v44 }
 0x133   : > { %v516_v3 = vpop.f32.mrf.mxu1 }
 0x134   : > { %v572_v4 = vadd.f32 %v571_v2, %v570_v1  ;;  %v566_v5 = vmul.f32 %v516_v3, %v1052_v9  ;;  %v625_v53 = vrot.slane %v624_v48, 1 }
 0x136   : > { %v575_v6 = vsel %vm567_vm0, %v566_v5, 0.0  ;;  %v573_v8 = vrot.slane %v572_v4, 1  ;;  %v626_v54 = vadd.f32 %v625_v53, %v624_v48 }
 0x137   : > { %v576_v10 = vrot.slane %v575_v6, 4 }
 0x138   : > { %v539_v63 = vpop.f32.mrf.mxu2  ;;  %v574_v11 = vadd.f32 %v573_v8, %v572_v4 }
 0x139   : > { %v577_v12 = vadd.f32 %v576_v10, %v575_v6  ;;  %v587_v13 = vmul.f32 %v585_v7, %v539_v63 }
 0x13a   : > { %632 = vperm.xlu0 %844, %v574_v11  }
 0x13b   : > { %v578_v14 = vrot.slane %v577_v12, 2  ;;  %v590_v15 = vsel %vm589_vm1, %v587_v13, 0.0 }
 0x13c   : > { %v591_v16 = vrot.slane %v590_v15, 4 }
 0x13d   : > { %v579_v17 = vadd.f32 %v578_v14, %v577_v12 }
 0x13e   : > { %v592_v18 = vadd.f32 %v591_v16, %v590_v15 }
 0x13f   : > { %v580_v19 = vrot.slane %v579_v17, 1 }
 0x140   : > { %v593_v20 = vrot.slane %v592_v18, 2 }
 0x141   : > { %v562_v21 = vpop.f32.mrf.mxu3  ;;  %v581_v9 = vadd.f32 %v580_v19, %v579_v17 }
 0x142   : > { %v588_v22 = vmul.f32 %v585_v7, %v562_v21  ;;  %v594_v23 = vadd.f32 %v593_v20, %v592_v18 }
 0x143   : > { %637 = vperm.xlu0 %844, %v581_v9  }
 0x144   : > { %v597_v24 = vsel %vm589_vm1, %v588_v22, 0.0  ;;  %v595_v26 = vrot.slane %v594_v23, 1 }
 0x145   : > { %v598_v25 = vrot.slane %v597_v24, 4 }
 0x146   : > { %v596_v29 = vadd.f32 %v595_v26, %v594_v23 }
 0x147   : > { %v599_v27 = vadd.f32 %v598_v25, %v597_v24 }
 0x149   : > { %v600_v28 = vrot.slane %v599_v27, 2 }
 0x14b   : > { %v601_v30 = vadd.f32 %v600_v28, %v599_v27  ;;  %847 = vset.pattern.permute.xlu0 %v924_v0  ;;  %v619_v0 = vrot.slane %v618_v43, 1 }
 0x14c   : > { %645 = vperm.xlu0 %847, %v596_v29  }
 0x14d   : > { %v602_v31 = vrot.slane %v601_v30, 1  ;;  %v620_v47 = vadd.f32 %v619_v0, %v618_v43 }
 0x14f   : > { %v603_v32 = vadd.f32 %v602_v31, %v601_v30 }
 0x154   : > { %650 = vperm.xlu0 %847, %v603_v32  }
 0x1ac   : > { %v633_v35 = vpop.permute.xlu0 %632 }
 0x1ad   : > { %v640_v49 = vsel %vm629_vm2, %v633_v35, 0.0 }
 0x1b5   : > { %v638_v41 = vpop.permute.xlu0 %637 }
 0x1b6   : > { %v641_v55 = vsel %vm629_vm2, %v638_v41, 0.0 }
 0x1be   : > { %v646_v50 = vpop.permute.xlu0 %645 }
 0x1bf   : > { %v653_v51 = vsel %vm642_vm3, %v646_v50, %v640_v49 }
 0x1c0   : > { %v656_v52 = vsel %vm655_vm4, %v620_v47, %v653_v51 }
 0x1c1   : > { %658 = vst [vmem:[%s295_s25] sm:$0x1] %v656_v52 }
 0x1c6   : > { %v651_v56 = vpop.permute.xlu0 %650 }
 0x1c7   : > { %v654_v57 = vsel %vm642_vm3, %v651_v56, %v641_v55 }
 0x1c8   : > { %v657_v58 = vsel %vm655_vm4, %v626_v54, %v654_v57 }
 0x1c9   : > { %659 = vst [vmem:[%s295_s25 + $0x1] sm:$0x1] %v657_v58 }
 0x1ca   : > { %887 = shalt.err (!%p884_p3)
}
 0x1cb   : > { %s928_s16 = smov 16  }
 0x1cc   : > { %800 = dma.vmem_to_hbm [thread:$0]  (%p999_p5), %s673_s26, 32, %s675_s28, %s661_s29, %s928_s16, %s928_s16, %s927_s13  }
 0x1cd PF: > { %p806_p4 = scmp.ge.s32.totalorder %s922_s24, 2  ;;  %s689_s18 = sand.u32 1, %s910_s21  }
 0x1ce   : > { %s690_s19 = scalar_lea.sflag [#allocation3], %s689_s18 }
 0x1cf   : > { %p803_p7 = pnand %p806_p4, %p1003_p6 }
 0x1d1   : > { %p804_p8 = pneg %p803_p7 }
 0x1d3   : > { %905 = dma.done.wait (%p804_p8), %s690_s19, 32  }
 0x1d4   : > { %907 = vsyncadd (%p804_p8), %s690_s19, 4294967264  ;;  %p16_p9 = scmp.ge.s32.totalorder %s987_s27, 4   ;;  %s1123_s21 = smov %s914_s22 }
 0x1d5   : > { %s1124_s22 = smov %s918_s23  ;;  %s1125_s23 = smov %s997_s30 }
 0x1d6   : > { %s1126_s24 = smov %s987_s27  ;;  %18 = sbr.rel (!%p16_p9) target bundleno = 3 (0x3), region = 88 }
 0x1db   :  { %696 = vsyncpa [#allocation3], 1 }
 0x1dc   :  { %698 = vsyncpa [#allocation3 + $0x1], 1 }

</bundles_post_ra>
